<compile_context>
chip_gen: v7x
topology: tpu7x:2x2x1
jax: 0.10.0
libtpu: 0.0.40
codegen_flags: <defaults>
</compile_context>

<pallas_src>
import functools

import jax
import jax.numpy as jnp
from jax.experimental import pallas as pl
from jax.experimental.pallas import tpu as pltpu


def _round_up(x, m):
    return (x + m - 1) // m * m


def _gelu(x):
    # exact (erf-based) GELU, matching torch.nn.functional.gelu default
    return 0.5 * x * (1.0 + jax.lax.erf(x * (2.0 ** -0.5)))


def conv_block_kernel(xa_ref, xb_ref, w1_ref, b1_ref, w2_ref, b2_ref, wp_ref, bp_ref,
                      o_ref, *, TT, T, K, dilation, pad):
    """One (batch, time-tile) block.

    xa_ref/xb_ref : (1, TT, Cin) bf16 -- time blocks i and i+1 of the padded input;
                    together they cover the halo window [t0 - 2*pad, t0 + TT + 2*pad).
    w1_ref : (K*Cin,  Coutp) bf16   im2col-reshaped conv1 weight
    w2_ref : (K*Coutp, Coutp) bf16  im2col-reshaped conv2 weight
    wp_ref : (Cin, Coutp) bf16      1x1 projector weight
    b*_ref : (1, Coutp) f32
    o_ref  : (1, TT, Coutp) f32     lane-dense (Coutp % 128 == 0) output tile
    """
    i = pl.program_id(1)

    # Halo window for this tile (spans exactly two TT blocks because TT >= 4*pad).
    xwin = jnp.concatenate([xa_ref[0], xb_ref[0]], axis=0)        # (2*TT, Cin) bf16
    xwin = xwin[:TT + 4 * pad, :]

    # gelu(x).  gelu(0) == 0, so gelu of the zero padding equals the zero padding
    # PyTorch's conv1 sees around gelu(x).
    g = _gelu(xwin.astype(jnp.float32)).astype(jnp.bfloat16)

    # conv1: im2col over the K dilated taps -> one MXU matmul with contraction K*Cin.
    e1 = TT + 2 * pad                                             # extended conv1 window
    slab1 = jnp.concatenate(
        [g[k * dilation:k * dilation + e1, :] for k in range(K)], axis=1)   # (e1, K*Cin)
    h = jnp.dot(slab1, w1_ref[...], preferred_element_type=jnp.float32) + b1_ref[...]

    # gelu, then zero the rows that fall outside the real sequence [0, T): this is the
    # zero padding conv2 must see (replaces the old full hpad scratch round-trip).
    t_glob = i * TT - pad + jax.lax.broadcasted_iota(jnp.int32, (e1, 1), 0)
    valid = (t_glob >= 0) & (t_glob < T)
    h = jnp.where(valid, _gelu(h), 0.0).astype(jnp.bfloat16)      # (e1, Coutp)

    # conv2: im2col -> one MXU matmul with contraction K*Coutp.
    slab2 = jnp.concatenate(
        [h[k * dilation:k * dilation + TT, :] for k in range(K)], axis=1)   # (TT, K*Coutp)
    out = jnp.dot(slab2, w2_ref[...], preferred_element_type=jnp.float32) + b2_ref[...]

    # residual = projector(x): 1x1 conv == per-timestep channel matmul.
    xc = xwin[2 * pad:2 * pad + TT, :]                            # (TT, Cin) bf16
    out = out + jnp.dot(xc, wp_ref[...], preferred_element_type=jnp.float32) + bp_ref[...]

    # dropout_p = 0.0 -> identity (inference semantics)
    # TODO(synk): training-mode dropout (p > 0) would need pltpu.prng_* masking here.
    o_ref[0] = out.astype(o_ref.dtype)


def conv_block_forward(x, params, *, kernel_size, dilation, t_tile=256):
    """x: (B, Cin, T) float32 (PyTorch NCL).  Returns (B, Cout, T) float32."""
    w1, b1, w2, b2, wp, bp = params
    B, Cin, T = x.shape
    Cout = w1.shape[2]
    K = kernel_size
    rf = (K - 1) * dilation + 1
    pad = rf // 2
    # SamePadConv trims the last element when rf is even, so in all cases
    # out[t] = sum_k in_pad[t + k*dilation] @ W[k] for t in [0, T).

    # Lane-dense output channels (zero-padded weights -> padded channels are exactly 0).
    Coutp = _round_up(Cout, 128)

    # Time tile: multiple of 8 (sublane) and >= 4*pad so the halo fits in two blocks.
    TT = _round_up(max(t_tile, 4 * pad, 8), 8)
    nt = pl.cdiv(T, TT)
    L = (nt + 1) * TT                                 # padded time length (extra tail block)

    def pad_out(a, axis):
        widths = [(0, 0)] * a.ndim
        widths[axis] = (0, Coutp - Cout)
        return jnp.pad(a, widths)

    # Weights: pad Cout, cast to bf16, reshape tap-major for the im2col matmuls.
    w1p = pad_out(w1, 2).astype(jnp.bfloat16).reshape(K * Cin, Coutp)
    w2p = pad_out(pad_out(w2, 2), 1).astype(jnp.bfloat16).reshape(K * Coutp, Coutp)
    wpp = pad_out(wp, 1).astype(jnp.bfloat16)
    b1p = pad_out(b1, 1).astype(jnp.float32)
    b2p = pad_out(b2, 1).astype(jnp.float32)
    bpp = pad_out(bp, 1).astype(jnp.float32)

    # NCL -> NTC, bf16, zero-pad time by 2*pad at the front and out to L total.
    # TODO(synk): the pad/transpose could be fused into the kernel with boundary masking
    # of the input reads; kept in the wrapper here (bf16 halves its HBM cost already).
    x_tc = jnp.transpose(x, (0, 2, 1)).astype(jnp.bfloat16)
    x_pad = jnp.pad(x_tc, ((0, 0), (2 * pad, L - T - 2 * pad), (0, 0)))

    kern = functools.partial(conv_block_kernel, TT=TT, T=T, K=K,
                             dilation=dilation, pad=pad)

    out_ntc = pl.pallas_call(
        kern,
        out_shape=jax.ShapeDtypeStruct((B, nt * TT, Coutp), jnp.float32),
        grid_spec=pltpu.PrefetchScalarGridSpec(
            num_scalar_prefetch=0,
            grid=(B, nt),
            in_specs=[
                # x passed twice: blocks i and i+1 give the halo window per tile.
                pl.BlockSpec((1, TT, Cin), lambda b, i: (b, i, 0)),
                pl.BlockSpec((1, TT, Cin), lambda b, i: (b, i + 1, 0)),
                # constant-index weights/biases: fetched once, resident across the grid
                pl.BlockSpec((K * Cin, Coutp), lambda b, i: (0, 0)),
                pl.BlockSpec((1, Coutp), lambda b, i: (0, 0)),
                pl.BlockSpec((K * Coutp, Coutp), lambda b, i: (0, 0)),
                pl.BlockSpec((1, Coutp), lambda b, i: (0, 0)),
                pl.BlockSpec((Cin, Coutp), lambda b, i: (0, 0)),
                pl.BlockSpec((1, Coutp), lambda b, i: (0, 0)),
            ],
            out_specs=pl.BlockSpec((1, TT, Coutp), lambda b, i: (b, i, 0)),
        ),
        compiler_params=pltpu.CompilerParams(
            dimension_semantics=("parallel", "parallel"),
            vmem_limit_bytes=48 * 1024 * 1024),
    )(x_pad, x_pad, w1p, b1p, w2p, b2p, wpp, bpp)

    out = out_ntc[:, :T, :Cout]                       # drop time/channel padding
    return jnp.transpose(out, (0, 2, 1)).astype(x.dtype)   # back to NCL


def ref_forward(x, params, *, kernel_size, dilation):
    """Plain-JAX f32 reference mirroring the PyTorch module (eval mode, dropout_p=0)."""
    w1, b1, w2, b2, wp, bp = params
    K = kernel_size
    rf = (K - 1) * dilation + 1
    pad = rf // 2
    remove = 1 if rf % 2 == 0 else 0

    def same_pad_conv(h, w, b):           # h: (B, C, T), w: (K, Cin, Cout)
        w_oik = jnp.transpose(w, (2, 1, 0))   # (Cout, Cin, K)
        out = jax.lax.conv_general_dilated(
            h, w_oik, window_strides=(1,), padding=[(pad, pad)],
            rhs_dilation=(dilation,),
            dimension_numbers=("NCH", "OIH", "NCH"))
        out = out + b.reshape(1, -1, 1)
        if remove:
            out = out[:, :, :-remove]
        return out

    residual = jnp.einsum("bct,co->bot", x, wp) + bp.reshape(1, -1, 1)
    h = _gelu(x)
    h = same_pad_conv(h, w1, b1)
    h = _gelu(h)
    h = same_pad_conv(h, w2, b2)
    return h + residual


def init_params(key, in_channels, out_channels, kernel_size):
    ks = jax.random.split(key, 6)
    s = 0.1
    w1 = s * jax.random.normal(ks[0], (kernel_size, in_channels, out_channels), jnp.float32)
    b1 = s * jax.random.normal(ks[1], (1, out_channels), jnp.float32)
    w2 = s * jax.random.normal(ks[2], (kernel_size, out_channels, out_channels), jnp.float32)
    b2 = s * jax.random.normal(ks[3], (1, out_channels), jnp.float32)
    wp = s * jax.random.normal(ks[4], (in_channels, out_channels), jnp.float32)
    bp = s * jax.random.normal(ks[5], (1, out_channels), jnp.float32)
    return (w1, b1, w2, b2, wp, bp)


if __name__ == "__main__":
    B, Cin, Cout, T = 2, 4, 8, 16
    kernel_size, dilation = 3, 2          # receptive field 5, padding 2, remove 0

    key = jax.random.PRNGKey(0)
    kx, kp = jax.random.split(key)
    x = jax.random.normal(kx, (B, Cin, T), jnp.float32)
    params = init_params(kp, Cin, Cout, kernel_size)

    # small t_tile so the demo exercises multi-tile time blocking + halo logic
    out = conv_block_forward(x, params, kernel_size=kernel_size, dilation=dilation,
                             t_tile=8)
    out = jax.block_until_ready(out)

    ref = ref_forward(x, params, kernel_size=kernel_size, dilation=dilation)
    assert out.shape == (B, Cout, T), out.shape
    # bf16 MXU inputs -> slightly looser tolerance vs. the f32 reference
    assert jnp.allclose(out, ref, rtol=2e-2, atol=3e-2), float(jnp.max(jnp.abs(out - ref)))

    print("KERNEL_OK")
</pallas_src>

<mosaic_0001>
module attributes {stable_mosaic.version = 11 : i64} {
  func.func @conv_block_kernel(%arg0: i32, %arg1: i32, %arg2: memref<1x8x4xbf16, #tpu.memory_space<vmem>>, %arg3: memref<1x8x4xbf16, #tpu.memory_space<vmem>>, %arg4: memref<12x128xbf16, #tpu.memory_space<vmem>>, %arg5: memref<1x128xf32, #tpu.memory_space<vmem>>, %arg6: memref<384x128xbf16, #tpu.memory_space<vmem>>, %arg7: memref<1x128xf32, #tpu.memory_space<vmem>>, %arg8: memref<4x128xbf16, #tpu.memory_space<vmem>>, %arg9: memref<1x128xf32, #tpu.memory_space<vmem>>, %arg10: memref<1x8x128xf32, #tpu.memory_space<vmem>>) attributes {dimension_semantics = [#tpu.dimension_semantics<parallel>, #tpu.dimension_semantics<parallel>], iteration_bounds = array<i64: 2, 2>, scalar_prefetch = 0 : i64, scratch_operands = 0 : i64, tpu.core_type = #tpu.core_type<tc>, window_params = [{transform_indices = @transform_0, window_bounds = array<i64: 1, 8, 4>}, {transform_indices = @transform_1, window_bounds = array<i64: 1, 8, 4>}, {pipeline_mode = #tpu.pipeline_mode<synchronous>, transform_indices = @transform_2, window_bounds = array<i64: 12, 128>}, {pipeline_mode = #tpu.pipeline_mode<synchronous>, transform_indices = @transform_3, window_bounds = array<i64: 1, 128>}, {pipeline_mode = #tpu.pipeline_mode<synchronous>, transform_indices = @transform_4, window_bounds = array<i64: 384, 128>}, {pipeline_mode = #tpu.pipeline_mode<synchronous>, transform_indices = @transform_5, window_bounds = array<i64: 1, 128>}, {pipeline_mode = #tpu.pipeline_mode<synchronous>, transform_indices = @transform_6, window_bounds = array<i64: 4, 128>}, {pipeline_mode = #tpu.pipeline_mode<synchronous>, transform_indices = @transform_7, window_bounds = array<i64: 1, 128>}, {transform_indices = @transform_8, window_bounds = array<i64: 1, 8, 128>}]} {
    %c0 = arith.constant 0 : index
    %c0_0 = arith.constant 0 : index
    %c0_1 = arith.constant 0 : index
    %0 = vector.load %arg2[%c0, %c0_0, %c0_1] : memref<1x8x4xbf16, #tpu.memory_space<vmem>>, vector<1x8x4xbf16>
    %1 = vector.shape_cast %0 : vector<1x8x4xbf16> to vector<8x4xbf16>
    %c0_2 = arith.constant 0 : index
    %c0_3 = arith.constant 0 : index
    %c0_4 = arith.constant 0 : index
    %2 = vector.load %arg3[%c0_2, %c0_3, %c0_4] : memref<1x8x4xbf16, #tpu.memory_space<vmem>>, vector<1x8x4xbf16>
    %3 = vector.shape_cast %2 : vector<1x8x4xbf16> to vector<8x4xbf16>
    %4 = tpu.concatenate %1, %3 in 0 : vector<8x4xbf16>, vector<8x4xbf16> -> vector<16x4xbf16>
    %5 = arith.extf %4 : vector<16x4xbf16> to vector<16x4xf32>
    %cst = arith.constant 5.000000e-01 : f32
    %6 = vector.broadcast %cst : f32 to vector<16x4xf32>
    %7 = arith.mulf %6, %5 : vector<16x4xf32>
    %cst_5 = arith.constant 0.707106769 : f32
    %8 = vector.broadcast %cst_5 : f32 to vector<16x4xf32>
    %9 = arith.mulf %5, %8 : vector<16x4xf32>
    %10 = math.erf %9 : vector<16x4xf32>
    %cst_6 = arith.constant 1.000000e+00 : f32
    %11 = vector.broadcast %cst_6 : f32 to vector<16x4xf32>
    %12 = arith.addf %11, %10 : vector<16x4xf32>
    %13 = arith.mulf %7, %12 : vector<16x4xf32>
    %14 = arith.truncf %13 : vector<16x4xf32> to vector<16x4xbf16>
    %15 = vector.extract_strided_slice %14 {offsets = [0, 0], sizes = [12, 4], strides = [1, 1]} : vector<16x4xbf16> to vector<12x4xbf16>
    %16 = vector.extract_strided_slice %14 {offsets = [2, 0], sizes = [12, 4], strides = [1, 1]} : vector<16x4xbf16> to vector<12x4xbf16>
    %17 = vector.extract_strided_slice %14 {offsets = [4, 0], sizes = [12, 4], strides = [1, 1]} : vector<16x4xbf16> to vector<12x4xbf16>
    %18 = tpu.concatenate %15, %16, %17 in 1 : vector<12x4xbf16>, vector<12x4xbf16>, vector<12x4xbf16> -> vector<12x12xbf16>
    %c0_7 = arith.constant 0 : index
    %c0_8 = arith.constant 0 : index
    %19 = vector.load %arg4[%c0_7, %c0_8] : memref<12x128xbf16, #tpu.memory_space<vmem>>, vector<12x128xbf16>
    %cst_9 = arith.constant dense<0.000000e+00> : vector<12x128xf32>
    %20 = tpu.matmul %18, %19, %cst_9 {dimension_numbers = #tpu.dot_dimension_numbers<[1], [0], [0], [1], [0, 0, 1, 1], [], []>} : vector<12x12xbf16>, vector<12x128xbf16>, vector<12x128xf32> -> vector<12x128xf32>
    %c0_10 = arith.constant 0 : index
    %c0_11 = arith.constant 0 : index
    %21 = vector.load %arg5[%c0_10, %c0_11] : memref<1x128xf32, #tpu.memory_space<vmem>>, vector<1x128xf32>
    %22 = vector.broadcast %21 : vector<1x128xf32> to vector<12x128xf32>
    %23 = arith.addf %20, %22 : vector<12x128xf32>
    %c8_i32 = arith.constant 8 : i32
    %24 = arith.muli %arg1, %c8_i32 : i32
    %c2_i32 = arith.constant 2 : i32
    %25 = arith.subi %24, %c2_i32 : i32
    %26 = tpu.iota {dimensions = array<i32: 0>} : vector<12x1xi32>
    %27 = vector.broadcast %25 : i32 to vector<12x1xi32>
    %28 = arith.addi %27, %26 : vector<12x1xi32>
    %c0_i32 = arith.constant 0 : i32
    %29 = vector.broadcast %c0_i32 : i32 to vector<12x1xi32>
    %30 = arith.cmpi sge, %28, %29 : vector<12x1xi32>
    %c16_i32 = arith.constant 16 : i32
    %31 = vector.broadcast %c16_i32 : i32 to vector<12x1xi32>
    %32 = arith.cmpi slt, %28, %31 : vector<12x1xi32>
    %33 = arith.andi %30, %32 : vector<12x1xi1>
    %cst_12 = arith.constant 5.000000e-01 : f32
    %34 = vector.broadcast %cst_12 : f32 to vector<12x128xf32>
    %35 = arith.mulf %34, %23 : vector<12x128xf32>
    %cst_13 = arith.constant 0.707106769 : f32
    %36 = vector.broadcast %cst_13 : f32 to vector<12x128xf32>
    %37 = arith.mulf %23, %36 : vector<12x128xf32>
    %38 = math.erf %37 : vector<12x128xf32>
    %cst_14 = arith.constant 1.000000e+00 : f32
    %39 = vector.broadcast %cst_14 : f32 to vector<12x128xf32>
    %40 = arith.addf %39, %38 : vector<12x128xf32>
    %41 = arith.mulf %35, %40 : vector<12x128xf32>
    %cst_15 = arith.constant 0.000000e+00 : f32
    %42 = vector.shape_cast %33 : vector<12x1xi1> to vector<12x1xi1>
    %43 = vector.broadcast %42 : vector<12x1xi1> to vector<12x128xi1>
    %44 = vector.broadcast %cst_15 : f32 to vector<12x128xf32>
    %45 = arith.select %43, %41, %44 : vector<12x128xi1>, vector<12x128xf32>
    %46 = arith.truncf %45 : vector<12x128xf32> to vector<12x128xbf16>
    %47 = vector.extract_strided_slice %46 {offsets = [0, 0], sizes = [8, 128], strides = [1, 1]} : vector<12x128xbf16> to vector<8x128xbf16>
    %48 = vector.extract_strided_slice %46 {offsets = [2, 0], sizes = [8, 128], strides = [1, 1]} : vector<12x128xbf16> to vector<8x128xbf16>
    %49 = vector.extract_strided_slice %46 {offsets = [4, 0], sizes = [8, 128], strides = [1, 1]} : vector<12x128xbf16> to vector<8x128xbf16>
    %50 = tpu.concatenate %47, %48, %49 in 1 : vector<8x128xbf16>, vector<8x128xbf16>, vector<8x128xbf16> -> vector<8x384xbf16>
    %c0_16 = arith.constant 0 : index
    %c0_17 = arith.constant 0 : index
    %51 = vector.load %arg6[%c0_16, %c0_17] : memref<384x128xbf16, #tpu.memory_space<vmem>>, vector<384x128xbf16>
    %cst_18 = arith.constant dense<0.000000e+00> : vector<8x128xf32>
    %52 = tpu.matmul %50, %51, %cst_18 {dimension_numbers = #tpu.dot_dimension_numbers<[1], [0], [0], [1], [0, 0, 1, 1], [], []>} : vector<8x384xbf16>, vector<384x128xbf16>, vector<8x128xf32> -> vector<8x128xf32>
    %c0_19 = arith.constant 0 : index
    %c0_20 = arith.constant 0 : index
    %53 = vector.load %arg7[%c0_19, %c0_20] : memref<1x128xf32, #tpu.memory_space<vmem>>, vector<1x128xf32>
    %54 = vector.broadcast %53 : vector<1x128xf32> to vector<8x128xf32>
    %55 = arith.addf %52, %54 : vector<8x128xf32>
    %56 = vector.extract_strided_slice %4 {offsets = [4, 0], sizes = [8, 4], strides = [1, 1]} : vector<16x4xbf16> to vector<8x4xbf16>
    %c0_21 = arith.constant 0 : index
    %c0_22 = arith.constant 0 : index
    %57 = vector.load %arg8[%c0_21, %c0_22] : memref<4x128xbf16, #tpu.memory_space<vmem>>, vector<4x128xbf16>
    %cst_23 = arith.constant dense<0.000000e+00> : vector<8x128xf32>
    %58 = tpu.matmul %56, %57, %cst_23 {dimension_numbers = #tpu.dot_dimension_numbers<[1], [0], [0], [1], [0, 0, 1, 1], [], []>} : vector<8x4xbf16>, vector<4x128xbf16>, vector<8x128xf32> -> vector<8x128xf32>
    %59 = arith.addf %55, %58 : vector<8x128xf32>
    %c0_24 = arith.constant 0 : index
    %c0_25 = arith.constant 0 : index
    %60 = vector.load %arg9[%c0_24, %c0_25] : memref<1x128xf32, #tpu.memory_space<vmem>>, vector<1x128xf32>
    %61 = vector.broadcast %60 : vector<1x128xf32> to vector<8x128xf32>
    %62 = arith.addf %59, %61 : vector<8x128xf32>
    %c0_26 = arith.constant 0 : index
    %c0_27 = arith.constant 0 : index
    %c0_28 = arith.constant 0 : index
    %63 = vector.load %arg10[%c0_26, %c0_27, %c0_28] : memref<1x8x128xf32, #tpu.memory_space<vmem>>, vector<1x8x128xf32>
    %64 = vector.shape_cast %63 : vector<1x8x128xf32> to vector<8x128xf32>
    %65 = vector.shape_cast %62 : vector<8x128xf32> to vector<1x8x128xf32>
    tpu.vector_store %arg10[%c0_26, %c0_27, %c0_28], %65 {strides = array<i32>} : memref<1x8x128xf32, #tpu.memory_space<vmem>>, vector<1x8x128xf32>,
    return
  }
  func.func @transform_0(%arg0: i32, %arg1: i32) -> (i32, i32, i32) {
    %c0_i32 = arith.constant 0 : i32
    %c0_i32_0 = arith.constant 0 : i32
    return %arg0, %arg1, %c0_i32 : i32, i32, i32
  }
  func.func @transform_1(%arg0: i32, %arg1: i32) -> (i32, i32, i32) {
    %c1_i32 = arith.constant 1 : i32
    %0 = arith.addi %arg1, %c1_i32 : i32
    %c0_i32 = arith.constant 0 : i32
    %c0_i32_0 = arith.constant 0 : i32
    return %arg0, %0, %c0_i32 : i32, i32, i32
  }
  func.func @transform_2(%arg0: i32, %arg1: i32) -> (i32, i32) {
    %c0_i32 = arith.constant 0 : i32
    %c0_i32_0 = arith.constant 0 : i32
    %c0_i32_1 = arith.constant 0 : i32
    return %c0_i32, %c0_i32_0 : i32, i32
  }
  func.func @transform_3(%arg0: i32, %arg1: i32) -> (i32, i32) {
    %c0_i32 = arith.constant 0 : i32
    %c0_i32_0 = arith.constant 0 : i32
    %c0_i32_1 = arith.constant 0 : i32
    return %c0_i32, %c0_i32_0 : i32, i32
  }
  func.func @transform_4(%arg0: i32, %arg1: i32) -> (i32, i32) {
    %c0_i32 = arith.constant 0 : i32
    %c0_i32_0 = arith.constant 0 : i32
    %c0_i32_1 = arith.constant 0 : i32
    return %c0_i32, %c0_i32_0 : i32, i32
  }
  func.func @transform_5(%arg0: i32, %arg1: i32) -> (i32, i32) {
    %c0_i32 = arith.constant 0 : i32
    %c0_i32_0 = arith.constant 0 : i32
    %c0_i32_1 = arith.constant 0 : i32
    return %c0_i32, %c0_i32_0 : i32, i32
  }
  func.func @transform_6(%arg0: i32, %arg1: i32) -> (i32, i32) {
    %c0_i32 = arith.constant 0 : i32
    %c0_i32_0 = arith.constant 0 : i32
    %c0_i32_1 = arith.constant 0 : i32
    return %c0_i32, %c0_i32_0 : i32, i32
  }
  func.func @transform_7(%arg0: i32, %arg1: i32) -> (i32, i32) {
    %c0_i32 = arith.constant 0 : i32
    %c0_i32_0 = arith.constant 0 : i32
    %c0_i32_1 = arith.constant 0 : i32
    return %c0_i32, %c0_i32_0 : i32, i32
  }
  func.func @transform_8(%arg0: i32, %arg1: i32) -> (i32, i32, i32) {
    %c0_i32 = arith.constant 0 : i32
    %c0_i32_0 = arith.constant 0 : i32
    return %arg0, %arg1, %c0_i32 : i32, i32, i32
  }
}

</mosaic_0001>

<bundles_post_ra>
// kernel: tpu_custom_call.1
= control target key start
LH: loop header
LB: loop body
LE: loop exit
PB: predicated region body
PF: predicated region fallthrough
CT: control target
= control target key end

     0   :  { %s1629_s0 = inlined_call_operand.vmem [shape: bf16[2,24,4], index: 0, kind: input, shape index: {}]   ;;  %s1630_s1 = inlined_call_operand.vmem [shape: bf16[2,24,4], index: 1, kind: input, shape index: {}]   ;;  %s1631_s2 = inlined_call_operand.vmem [shape: bf16[12,128], index: 2, kind: input, shape index: {}]   ;;  %s1632_s3 = inlined_call_operand.vmem [shape: f32[1,128], index: 3, kind: input, shape index: {}]   ;;  %s1633_s4 = inlined_call_operand.hbm [shape: bf16[384,128], index: 4, kind: input, shape index: {}]   ;;  %s1634_s5 = inlined_call_operand.vmem [shape: f32[1,128], index: 5, kind: input, shape index: {}]   ;;  %s1635_s6 = inlined_call_operand.vmem [shape: bf16[4,128], index: 6, kind: input, shape index: {}]   ;;  %s1636_s7 = inlined_call_operand.vmem [shape: f32[1,128], index: 7, kind: input, shape index: {}]   ;;  %s1637_s8 = inlined_call_operand.hbm [shape: f32[2,16,128], index: 8, kind: output, shape index: {}]  }
   0x1   :  { %1646 = sst [smem:[#allocation12_spill]] %s1633_s4 }
   0x2   :  { %13 = vsyncpa [#allocation3], 0 }
   0x3   :  { %14 = vsyncpa [#allocation4], 0 }
   0x4   :  { %16 = vsyncpa [#allocation4 + $0x1], 0  ;;  %s1403_s27 = smov 0   ;;  %s1405_s28 = smov 0  }
   0x5   :  { %s1407_s29 = smov 0   ;;  %s1409_s30 = smov 0  }
   0x6   :  { %s1411_s9 = smov 0   ;;  %s1413_s10 = smov 0  }
   0x7   :  { %s1415_s11 = smov 0   ;;  %s1417_s12 = smov 0  }
   0x8 LB: > { %1647 = sst [smem:[#allocation8_spill]] %s1340_s10  ;;  %s981_s13 = sadd.s32 4294967295, %s1348_s12   ;;  %s1348_s12 = sphi %s1417_s12, %s22_s12   ;;  %s1344_s11 = sphi %s1415_s11, %s1666_s11   ;;  %s1340_s10 = sphi %s1413_s10, %s1665_s10   ;;  %s1336_s9 = sphi %s1411_s9, %s1664_s9   ;;  %s1332_s30 = sphi %s1409_s30, %s1663_s30   ;;  %s1328_s29 = sphi %s1407_s29, %s1669_s29   ;;  %s1324_s28 = sphi %s1405_s28, %s1668_s28   ;;  %s1320_s27 = sphi %s1403_s27, %s1667_s27  }
   0x9   : > { %1648 = sst [smem:[#allocation9_spill]] %s1344_s11  ;;  %s982_s14 = sadd.s32 4294967294, %s1348_s12  }
   0xa   : > { %s31_s15 = sadd.s32 1, %s1340_s10  ;;  %s34_s16 = sadd.s32 1, %s1344_s11 }
   0xb   : > { %p32_p0 = scmp.ge.s32.totalorder %s31_s15, 2  ;;  %s227_s17 = sadd.s32 1, %s1328_s29 }
   0xc   : > { %p237_p1 = scmp.ne.s32.totalorder %s1328_s29, %s1324_s28  ;;  %p238_p2 = scmp.eq.s32.totalorder %s981_s13, 3 }
   0xd   : > { %s1671_s15 = smov (%p32_p0, %s31_s15), 0  ;;  %s1673_s16 = smov (!%p32_p0, %s34_s16), %s1344_s11 }
   0xe   : > { %1649 = sst [smem:[#allocation10_spill]] %s1671_s15  ;;  %s223_s18 = ssub.s32 %s1340_s10, %s1671_s15 }
   0xf   : > { %p1455_p3 = por %p238_p2, %p237_p1  ;;  %p36_p4 = scmp.ge.s32.totalorder %s1673_s16, 2 }
  0x10   : > { %p243_p5 = scmp.ne.s32.totalorder %s1324_s28, %s1320_s27  ;;  %p244_p6 = scmp.eq.s32.totalorder %s982_s14, 3 }
  0x11   : > { %s1650_s19 = scalar_select %p1455_p3, 1, 0 }
  0x12   : > { %p983_p7 = scmp.ge.s32.totalorder %s1348_s12, 1  ;;  %s1675_s16 = smov (%p36_p4, %s1673_s16), 0 }
  0x13   : > { %1651 = sst [smem:[#allocation11_spill]] %s1675_s16  ;;  %p1464_p8 = por %p244_p6, %p243_p5 }
  0x14   : > { %p251_p9 = scmp.lt.s32.totalorder %s1348_s12, 5  ;;  %s222_s21 = ssub.s32 %s1344_s11, %s1675_s16 }
  0x15   : > { %s1652_s20 = scalar_select %p1464_p8, 1, 0 }
  0x16   : > { %s224_s22 = sor.u32 %s223_s18, %s222_s21  ;;  %p1471_p10 = pnand %p983_p7, %p251_p9 }
  0x17   : > { %p225_p11 = scmp.eq.s32.totalorder %s224_s22, 0  ;;  %p1475_p12 = scmp.eq.s32.totalorder %s981_s13, 0 }
  0x18   : > { %s1653_s23 = scalar_select %p1471_p10, 1, 0 }
  0x19   : > { %s1654_s24 = scalar_select %p1475_p12, 1, 0 }
  0x1a   : > { %p1106_p13 = pneg %p1471_p10  ;;  %s1350_s26 = smov [#allocation2]  }
  0x1b   : > { %s1482_s25 = scalar_select %p225_p11, %s1328_s29, %s227_s17  }
  0x1c   : > { %s269_s14 = sshll.u32 %s1350_s26, 4  ;;  %p1486_p0 = pnand %p1475_p12, %p1106_p13  ;;  %s270_s14 = int_to_ptr.vmem [resolvable:$true] %s269_s14 }
  0x1d   : > { %s1656_s4 = sld [smem:[#allocation12_spill]] }
  0x1e   : > { %p1224_p2 = pneg %p1486_p0 }
  0x23   : > { %s1222_s13 = scalar_lea.hbm %s1656_s4, 3072 }
  0x24   : > { %p1223_p1 = scmp.ne.s32.totalorder %s1656_s4, %s1222_s13  ;;  %p1229_p6 = scmp.lt.u32.totalorder %s1222_s13, %s1656_s4 }
  0x26   : > { %p1225_p4 = pnand %p1224_p2, %p1223_p1 }
  0x28   : > { %p1226_p5 = pneg %p1225_p4 }
  0x2a   : > { %p1231_p7 = pnand %p1229_p6, %p1226_p5 }
  0x2c   : > { %1234 = shalt.err (!%p1231_p7)
}
  0x2d   : > { %s1235_s11 = scalar_lea.vmem %s270_s14, 3072  ;;  %p1243_p8 = scmp.lt.s32.totalorder %s270_s14, %s270_s14 }
  0x2e   : > { %p1236_p9 = scmp.ne.s32.totalorder %s270_s14, %s1235_s11  ;;  %p1244_p3 = scmp.lt.s32.totalorder %s1235_s11, %s1235_s11 }
  0x30   : > { %p1238_p11 = pnand %p1236_p9, %p1224_p2  ;;  %p1245_p12 = por %p1244_p3, %p1243_p8 }
  0x32   : > { %p1239_p13 = pneg %p1238_p11 }
  0x34   : > { %p1246_p10 = pnand %p1245_p12, %p1239_p13 }
  0x36   : > { %1249 = shalt.err (!%p1246_p10)
}
  0x37   : > { %s1351_s15 = smov 64   ;;  %s1352_s16 = smov 4  }
  0x38   : > { %1109 = dma.hbm_to_vmem [thread:$0]  (!%p1486_p0), %s1656_s4, 3072, %s270_s14, [#allocation3], %s1351_s15, %s1351_s15, %s1352_s16  }
  0x39   : > { %p1657_p1 = scmp.ne.s32.totalorder %s1653_s23, 0 }
  0x3a   : > { %p1658_p4 = scmp.ne.s32.totalorder (!%p1657_p1), %s1654_s24, 0 }
  0x3b   : > { %318 = sbr.rel (%p1657_p1) target bundleno = 700 (0x2bc), region = 52 }
  0x42   : > { %1311 = dma.done.wait (%p1658_p4), [#allocation3], 3072  }
  0x43   : > { %1313 = vsyncadd (%p1658_p4), [#allocation3], 4294964224  ;;  %p364_p3 = scmp.lt.s32.totalorder %s1336_s9, 1  ;;  %p366_p8 = scmp.lt.s32.totalorder %s1332_s30, 2  ;;  %vm388_vm0 = vcmask 1043456   ;;  %vm437_vm1 = vcmask 1045504   ;;  %v484_v51 = vlaneseq }
  0x44   : > { %s372_s11 = sadd.s32 1, %s1332_s30  ;;  %v1189_v7 = vld [vmem:[%s1631_s2] sm:$0x3f]   ;;  %v1353_v8 = vmov 0.0   ;;  %vm1354_vm2 = vmmov 0   ;;  %v1193_v19 = vld [vmem:[#allocation2 + $0x48] sm:$0xff]  }
  0x45   : > { %s365_s18 = scalar_select %p364_p3, %s1336_s9, 1  ;;  %1067 = vmatprep.subr.bf16.mxu0 %v1353_v8  ;;  %v439_v9 = vsel %vm437_vm1, %v1189_v7, 0  ;;  %1069 = vmatprep.mubr.msk.bf16.mxu0 %vm1354_vm2, %v1353_v8  ;;  %v1190_v16 = vld [vmem:[#allocation2 + $0x40] sm:$0xff]   ;;  %vm413_vm3 = vcmask 31744   ;;  %vm417_vm4 = vcmask 64512   ;;  %vm434_vm5 = vcmask 97280  }
  0x46   : > { %s367_s13 = scalar_select %p366_p8, %s1332_s30, 2  ;;  %1068 = vmatpush3.bf16.msra.mxu0 %v439_v9  ;;  %v1191_v17 = vld [vmem:[#allocation2] sm:$0xff]   ;;  %1034 = vmatprep.subr.bf16.mxu1 %v1190_v16  ;;  %v1195_v29 = vld [vmem:[#allocation2 + $0x88] sm:$0xff]   ;;  %v1196_v31 = vld [vmem:[#allocation2 + $0x50] sm:$0xff]   ;;  %v485_v58 = vshrl.u32 %v484_v51, 7  ;;  %vm803_vm12 = vcmask 1041408  }
  0x47   : > { %s1099_s14 = smul.u32 3, %s365_s18  ;;  %p375_p10 = scmp.lt.s32.totalorder %s372_s11, 2  ;;  %1073 = vmatprep.subr.bf16.mxu0 %v1353_v8  ;;  %1035 = vmatpush3.bf16.msra.mxu1 %v1191_v17  ;;  %v1192_v25 = vld [vmem:[#allocation2 + $0x80] sm:$0xff]   ;;  %v1194_v30 = vld [vmem:[#allocation2 + $0x8] sm:$0xff]   ;;  %v1198_v32 = vld [vmem:[#allocation2 + $0x90] sm:$0xff]  }
  0x48   : > { %1036 = vmatprep.subr.bf16.mxu1 %v1193_v19  ;;  %s1355_s4 = smov 4   ;;  %v1197_v33 = vld [vmem:[#allocation2 + $0x10] sm:$0xff]   ;;  %v1199_v34 = vld [vmem:[#allocation2 + $0x58] sm:$0xff]   ;;  %v1202_v37 = vld [vmem:[#allocation2 + $0x60] sm:$0xff]   ;;  %v486_v60 = vadd.s32 8, %v485_v58  ;;  %s1028_s18 = sshll.u32 %s1336_s9, 1 }
  0x49   : > { %s369_s23 = sadd.s32 %s1099_s14, %s367_s13  ;;  %s1677_s11 = smov (!%p375_p10, %s372_s11), 2  ;;  %v1201_v35 = vld [vmem:[#allocation2 + $0x98] sm:$0xff]   ;;  %v1204_v38 = vld [vmem:[#allocation2 + $0xa0] sm:$0xff]   ;;  %v1205_v40 = vld [vmem:[#allocation2 + $0x68] sm:$0xff]  }
  0x4a   : > { %s989_s17 = sshll.u32 %s369_s23, 2  ;;  %s378_s24 = sadd.s32 %s1099_s14, %s1677_s11  ;;  %v1200_v36 = vld [vmem:[#allocation2 + $0x18] sm:$0xff]   ;;  %v1203_v39 = vld [vmem:[#allocation2 + $0x20] sm:$0xff]   ;;  %v1207_v41 = vld [vmem:[#allocation2 + $0xa8] sm:$0xff]  }
  0x4b   : > { %s371_s16 = scalar_lea.vmem %s1629_s0, %s989_s17  ;;  %s990_s21 = sshll.u32 %s378_s24, 2  ;;  %1037 = vmatpush3.bf16.msra.mxu1 %v1194_v30  ;;  %v1206_v42 = vld [vmem:[#allocation2 + $0x28] sm:$0xff]   ;;  %v1208_v43 = vld [vmem:[#allocation2 + $0x70] sm:$0xff]   ;;  %v1211_v46 = vld [vmem:[#allocation2 + $0x78] sm:$0xff]  }
  0x4c   : > { %v383_v0 = vld [vmem:[%s371_s16] sm:$0xf]  ;;  %s380_s10 = scalar_lea.vmem %s1630_s1, %s990_s21  ;;  %1038 = vmatprep.subr.bf16.mxu1 %v1196_v31  ;;  %v1210_v44 = vld [vmem:[#allocation2 + $0xb0] sm:$0xff]   ;;  %v1212_v47 = vld [vmem:[#allocation2 + $0x38] sm:$0xff]   ;;  %s995_s23 = sshll.u32 %s1332_s30, 3 }
  0x4d   : > { %v1188_v1 = vld [vmem:[%s380_s10] ss:$0 sps:$4 sm:$0xff]   ;;  %s1356_s10 = smov 8   ;;  %v1209_v45 = vld [vmem:[#allocation2 + $0x30] sm:$0xff]   ;;  %v1213_v48 = vld [vmem:[#allocation2 + $0xb8] sm:$0xff]   ;;  %s996_s17 = sadd.s32 4294967294, %s995_s23 }
  0x4e   : > { %v1523_v2 = vsel %vm388_vm0, %v383_v0, %v1188_v1  ;;  %v992_v49 = vld [vmem:[%s1632_s3] ss:$0 sm:$0xff]  ;;  %v487_v61 = vstv %s996_s17  ;;  %s361_s16 = sand.u32 1, %s1324_s28   ;;  %s869_s11 = sadd.s32 %s1332_s30, %s1028_s18 }
  0x4f   : > { %v393_v3 = vunpack.c.l.bf16 %v1523_v2  ;;  %v394_v4 = vunpack.c.h.bf16 %v1523_v2  ;;  %1039 = vmatpush3.bf16.msra.mxu1 %v1197_v33  ;;  %v488_v62 = vadd.s32 %v487_v61, %v485_v58  ;;  %v489_v63 = vadd.s32 %v487_v61, %v486_v60  ;;  %s988_s22 = sshll.u32 %s361_s16, 3  ;;  %v1026_v31 = vld [vmem:[%s1636_s7] ss:$0 sm:$0xff]  ;;  %s1029_s13 = sshll.u32 %s869_s11, 7 }
  0x50   : > { %1040 = vmatprep.subr.bf16.mxu1 %v1199_v34  ;;  %v799_v19 = vrot.slane %v1523_v2, 2  ;;  %s363_s14 = scalar_lea.vmem [#allocation5], %s988_s22  ;;  %s1576_s26 = scalar_lea.hbm %s1637_s8, %s1029_s13 }
  0x51   : > { %v397_v5 = vmul.f32 0.70710677, %v393_v3  ;;  %v398_v6 = vmul.f32 0.70710677, %v394_v4  ;;  %v395_v10 = vmul.f32 0.5, %v393_v3  ;;  %v396_v12 = vmul.f32 0.5, %v394_v4 }
  0x52   : > { %vm490_vm6 = vcmp.ge.s32.totalorder %v488_v62, 0  ;;  %vm492_vm7 = vcmp.lt.s32.totalorder %v488_v62, 16  ;;  %vm491_vm8 = vcmp.ge.s32.totalorder %v489_v63, 0  ;;  %vm493_vm9 = vcmp.lt.s32.totalorder %v489_v63, 16  ;;  %s873_s23 = sshll.u32 %s363_s14, 4  ;;  %s858_s30 = scalar_lea.sflag [#allocation4], %s361_s16  ;;  %s1578_s23 = int_to_ptr.vmem [resolvable:$true] %s873_s23 }
  0x53   : > { %1214 = verf.f32 %v397_v5  ;;  %1041 = vmatpush3.bf16.msra.mxu1 %v1200_v36  ;;  %vm1549_vm10 = vmand %vm490_vm6, %vm492_vm7  ;;  %s1250_s15 = scalar_lea.vmem %s1578_s23, 128  ;;  %p1661_p0 = scmp.ne.s32.totalorder %s1650_s19, 0 }
  0x54   : > { %1216 = verf.f32 %v398_v6  ;;  %1042 = vmatprep.subr.bf16.mxu1 %v1202_v37  ;;  %vm495_vm11 = vmand %vm491_vm8, %vm493_vm9  ;;  %p1251_p12 = scmp.ne.s32.totalorder %s1578_s23, %s1250_s15  ;;  %s1357_s24 = smov [#allocation5]  }
  0x55   : > { %vm1022_vm13 = vmpackc.low %vm495_vm11, %vm1549_vm10  ;;  %s1254_s21 = sshll.u32 %s1357_s24, 4  ;;  %s1255_s21 = int_to_ptr.vmem [resolvable:$false] %s1254_s21 }
  0x56   : > { %p1252_p2 = pnand %p1251_p12, %p1661_p0  ;;  %s1256_s22 = scalar_lea.vmem %s1255_s21, 256 }
  0x57   : > { %1043 = vmatpush3.bf16.msra.mxu1 %v1203_v39  ;;  %p1257_p6 = scmp.lt.s32.totalorder %s1578_s23, %s1255_s21  ;;  %p1258_p7 = scmp.lt.s32.totalorder %s1256_s22, %s1250_s15 }
  0x58   : > { %1044 = vmatprep.subr.bf16.mxu1 %v1205_v40  ;;  %p1253_p5 = pneg %p1252_p2 }
  0x59   : > { %p1259_p9 = por %p1258_p7, %p1257_p6 }
  0x5b   : > { %1045 = vmatpush3.bf16.msra.mxu1 %v1206_v42  ;;  %p1260_p11 = pnand %p1259_p9, %p1253_p5 }
  0x5c   : > { %1046 = vmatprep.subr.bf16.mxu1 %v1208_v43 }
  0x5d   : > { %v1215_v11 = vpop.eup %1214 }
  0x5e   : > { %v1217_v13 = vpop.eup %1216  ;;  %v401_v14 = vadd.f32 1.0, %v1215_v11 }
  0x5f   : > { %v402_v15 = vadd.f32 1.0, %v1217_v13  ;;  %1047 = vmatpush3.bf16.msra.mxu1 %v1209_v45 }
  0x60   : > { %v403_v18 = vmul.f32 %v401_v14, %v395_v10  ;;  %1048 = vmatprep.subr.bf16.mxu1 %v1211_v46 }
  0x61   : > { %v404_v20 = vmul.f32 %v402_v15, %v396_v12  ;;  %v797_v15 = vld [vmem:[%s1635_s6] sm:$0x3] }
  0x63   : > { %v405_v21 = vpack.c.bf16 %v404_v20, %v403_v18  ;;  %1049 = vmatpush3.bf16.msra.mxu1 %v1212_v47  ;;  %v805_v18 = vsel %vm803_vm12, %v797_v15, 0 }
  0x64   : > { %1093 = vmatprep.subr.bf16.mxu1 %v1353_v8 }
  0x65   : > { %v407_v22 = vrot.slane %v405_v21, 1  ;;  %v410_v23 = vrot.slane %v405_v21, 2 }
  0x67   : > { %408 = vrot.lane.b32.xlu0 %v407_v22, %s1355_s4 }
  0x6b   : > { %411 = vrot.lane.b32.xlu0 %v410_v23, %s1356_s10  ;;  %v997_v23 = vld [vmem:[%s1634_s5] ss:$0 sm:$0xff] }
  0xd9   : > { %v409_v24 = vpop.permute.xlu0 %408 }
  0xda   : > { %v416_v26 = vsel %vm413_vm3, %v405_v21, %v409_v24 }
  0xdd   : > { %v412_v27 = vpop.permute.xlu0 %411 }
  0xde   : > { %v419_v28 = vsel %vm417_vm4, %v416_v26, %v412_v27 }
  0xdf   : > { %1070 = vmatmul.mubr.msk.bf16.vlgmr.msra.gmra.mrb[0].mxu0 %vm434_vm5, %v419_v28 }
  0xe0   : > { %1074 = vmatpush3.bf16.msra.mxu0 %v1192_v25  ;;  %1089 = vmatprep.mubr.msk.bf16.mxu0 %vm1354_vm2, %v1353_v8 }
  0xe1   : > { %1075 = vmatprep.subr.bf16.mxu0 %v1353_v8 }
  0xe4   : > { %1076 = vmatpush3.bf16.msra.mxu0 %v1195_v29 }
  0xe5   : > { %1077 = vmatprep.subr.bf16.mxu0 %v1353_v8 }
  0xe8   : > { %1078 = vmatpush3.bf16.msra.mxu0 %v1198_v32 }
  0xe9   : > { %1079 = vmatprep.subr.bf16.mxu0 %v1353_v8 }
  0xec   : > { %1080 = vmatpush3.bf16.msra.mxu0 %v1201_v35 }
  0xed   : > { %1081 = vmatprep.subr.bf16.mxu0 %v1353_v8 }
  0xf0   : > { %1082 = vmatpush3.bf16.msra.mxu0 %v1204_v38 }
  0xf1   : > { %1083 = vmatprep.subr.bf16.mxu0 %v1353_v8 }
  0xf4   : > { %1084 = vmatpush3.bf16.msra.mxu0 %v1207_v41 }
  0xf5   : > { %1085 = vmatprep.subr.bf16.mxu0 %v1353_v8 }
  0xf8   : > { %1086 = vmatpush3.bf16.msra.mxu0 %v1210_v44 }
  0xf9   : > { %1087 = vmatprep.subr.bf16.mxu0 %v1353_v8 }
  0xfc   : > { %1088 = vmatpush3.bf16.msra.mxu0 %v1213_v48 }
 0x1b2   : > { %v475_v50 = vpop.f32.mrb[0].mxu0 }
 0x1b3   : > { %v476_v52 = vadd.f32 %v992_v49, %v475_v50  ;;  %v1071_v53 = vpop.f32.mrb[1].mxu0 }
 0x1b4   : > { %v478_v54 = vpop.f32.mrb[2].mxu0 }
 0x1b5   : > { %v498_v55 = vmul.f32 0.70710677, %v476_v52  ;;  %v479_v56 = vadd.f32 %v992_v49, %v478_v54  ;;  %v1072_v57 = vpop.f32.mrb[3].mxu0  ;;  %v496_v1 = vmul.f32 0.5, %v476_v52 }
 0x1b7   : > { %1218 = verf.f32 %v498_v55  ;;  %v499_v59 = vmul.f32 0.70710677, %v479_v56  ;;  %v497_v6 = vmul.f32 0.5, %v479_v56 }
 0x1b9   : > { %1220 = verf.f32 %v499_v59 }
 0x1c1   : > { %v1219_v0 = vpop.eup %1218 }
 0x1c2   : > { %v502_v3 = vadd.f32 1.0, %v1219_v0 }
 0x1c3   : > { %v1221_v4 = vpop.eup %1220 }
 0x1c4   : > { %v504_v5 = vmul.f32 %v502_v3, %v496_v1  ;;  %v503_v7 = vadd.f32 1.0, %v1221_v4 }
 0x1c6   : > { %v505_v10 = vmul.f32 %v503_v7, %v497_v6  ;;  %v510_v12 = vsel %vm1549_vm10, %v504_v5, 0.0 }
 0x1c8   : > { %v1023_v11 = vpack.c.bf16 %v505_v10, %v504_v5  ;;  %v511_v13 = vsel %vm495_vm11, %v505_v10, 0.0 }
 0x1c9   : > { %v512_v14 = vpack.c.bf16 %v511_v13, %v510_v12 }
 0x1cb   : > { %v514_v16 = vrot.slane %v512_v14, 1  ;;  %v516_v17 = vrot.slane %v512_v14, 2 }
 0x1cd   : > { %749 = vmatprep.mubr.bf16.mxu1 %v514_v16  ;;  %1090 = vmatmul.mubr.bf16.vlgmr.msra.gmra.mrb[4].mxu0 %v516_v17 }
 0x1ce   : > { %1024 = vmatmul.mubr.msk.bf16.vlgmr.msra.gmra.mrb[0].mxu1 %vm1022_vm13, %v1023_v11 }
 0x1cf   : > { %1094 = vmatpush3.bf16.msra.mxu1 %v805_v18  ;;  %1095 = vmatprep.mubr.msk.bf16.mxu1 %vm1354_vm2, %v1353_v8 }
 0x1d6   : > { %1096 = vmatmul.mubr.msk.bf16.vlgmr.msra.gmra.mrb[4].mxu1 %vm413_vm3, %v799_v19 }
 0x2a0   : > { %v791_v20 = vpop.f32.mrb[4].mxu0 }
 0x2a1   : > { %v1050_v21 = vpop.f32.mrb[0].mxu1  ;;  %v1091_v22 = vpop.f32.mrb[5].mxu0 }
 0x2a2   : > { %v1051_v24 = vpop.f32.mrb[1].mxu1  ;;  %v794_v25 = vpop.f32.mrb[6].mxu0 }
 0x2a3   : > { %v1052_v26 = vadd.f32 %v1051_v24, %v1050_v21  ;;  %v1053_v27 = vpop.f32.mrb[2].mxu1  ;;  %v1092_v28 = vpop.f32.mrb[7].mxu0 }
 0x2a4   : > { %v1054_v8 = vpop.f32.mrb[3].mxu1 }
 0x2a5   : > { %v752_v2 = vadd.f32 %v1052_v26, %v997_v23 }
 0x2a7   : > { %v792_v29 = vadd.f32 %v791_v20, %v752_v2 }
 0x2a9   : > { %v841_v30 = vpop.f32.mrb[4].mxu1 }
 0x2aa   : > { %v847_v32 = vadd.f32 %v841_v30, %v792_v29  ;;  %v1097_v33 = vpop.f32.mrb[5].mxu1 }
 0x2ab   : > { %v844_v34 = vpop.f32.mrb[6].mxu1 }
 0x2ac   : > { %v855_v35 = vadd.f32 %v1026_v31, %v847_v32  ;;  %v1098_v36 = vpop.f32.mrb[7].mxu1 }
 0x2ae   : > { %856 = vst [vmem:[%s363_s14] sm:$0xff] %v855_v35 }
 0x2af   : > { %1263 = shalt.err (!%p1260_p11)
}
 0x2b0   : > { %s1264_s16 = scalar_lea.hbm %s1576_s26, 128  ;;  %s1268_s4 = scalar_lea.hbm %s1637_s8, 512 }
 0x2b1   : > { %p1265_p13 = scmp.ne.s32.totalorder %s1576_s26, %s1264_s16  ;;  %p1269_p3 = scmp.lt.u32.totalorder %s1576_s26, %s1637_s8 }
 0x2b2   : > { %p1270_p8 = scmp.lt.u32.totalorder %s1268_s4, %s1264_s16  ;;  %p1272_p12 = scmp.lt.u32.totalorder %s1264_s16, %s1576_s26 }
 0x2b3   : > { %p1266_p1 = pnand %p1265_p13, %p1661_p0 }
 0x2b4   : > { %p1271_p10 = por %p1270_p8, %p1269_p3 }
 0x2b5   : > { %p1267_p4 = pneg %p1266_p1 }
 0x2b6   : > { %p1273_p2 = por %p1272_p12, %p1271_p10 }
 0x2b8   : > { %p1274_p5 = pnand %p1273_p2, %p1267_p4 }
 0x2ba   : > { %1277 = shalt.err (!%p1274_p5)
}
 0x2bb   : > { %1104 = dma.vmem_to_hbm [thread:$0]  (%p1661_p0), %s1578_s23, 128, %s1576_s26, %s858_s30  }
 0x2bc PF: > { %p1116_p6 = scmp.ge.s32.totalorder %s1348_s12, 2  ;;  %s885_s14 = sand.u32 1, %s1320_s27  }
 0x2bd   : > { %p1662_p7 = scmp.ne.s32.totalorder %s1652_s20, 0  ;;  %s886_s17 = scalar_lea.sflag [#allocation4], %s885_s14 }
 0x2bf   : > { %p1111_p9 = pnand %p1116_p6, %p1662_p7 }
 0x2c1   : > { %1315 = dma.done.wait (!%p1111_p9), %s886_s17, 128  }
 0x2c2   : > { %1317 = vsyncadd (!%p1111_p9), %s886_s17, 4294967168  ;;  %s22_s12 = sadd.s32 1, %s1348_s12   ;;  %s1663_s30 = sld [smem:[#allocation8_spill]] }
 0x2c3   : > { %p19_p11 = scmp.ge.s32.totalorder %s22_s12, 6   ;;  %s1664_s9 = sld [smem:[#allocation9_spill]] }
 0x2c4   : > { %s1665_s10 = sld [smem:[#allocation10_spill]]  ;;  %s1666_s11 = sld [smem:[#allocation11_spill]] }
 0x2c5   : > { %s1667_s27 = smov %s1324_s28  ;;  %s1668_s28 = smov %s1328_s29 }
 0x2c6   : > { %s1669_s29 = smov %s1482_s25  ;;  %21 = sbr.rel (!%p19_p11) target bundleno = 8 (0x8), region = 95 }
 0x2cd   :  { %891 = vsyncpa [#allocation3], 1 }
 0x2ce   :  { %893 = vsyncpa [#allocation3 + $0x1], 1 }
 0x2cf   :  { %894 = vsyncpa [#allocation4], 1 }
 0x2d0   :  { %896 = vsyncpa [#allocation4 + $0x1], 1 }

</bundles_post_ra>
